<compile_context>
chip_gen: v7x
topology: tpu7x:2x2x1
jax: 0.10.0
libtpu: 0.0.40
codegen_flags: <defaults>
</compile_context>

<pallas_src>
import functools

import jax
import jax.numpy as jnp
from jax.experimental import pallas as pl
from jax.experimental.pallas import tpu as pltpu

KH = KW = 4
STRIDE = 2
EPS = 1e-5
NEG_SLOPE = 0.2

_VMEM_LIMIT = 32 * 1024 * 1024   # safe on v5e / v6e / v7x; tiles sized to fit inside it
_STAT_CHUNK = 128                # rows per stats-epilogue chunk (bounds vreg pressure)


def _round_up(a, m):
    return -(-a // m) * m


# --------------------------------------------------------------------------- #
# Phase 1: conv (im2col matmul) + per-channel sum / sum-of-squares             #
# --------------------------------------------------------------------------- #
def _conv_stats_kernel(p_ref, w_ref, conv_ref, sum_ref, ssq_ref, acc_ref):
    # p_ref:    (TP, TK)   im2col patch tile (matmul dtype)
    # w_ref:    (TK, TO)   flattened conv weight tile (matmul dtype)
    # conv_ref: (TP, TO)   conv output tile (matmul dtype)
    # sum_ref:  (1, TO)    per-channel running sum   (f32, resident across P/K)
    # ssq_ref:  (1, TO)    per-channel running sumsq (f32, resident across P/K)
    # acc_ref:  (TP, TO)   f32 MXU accumulator scratch (resident across K)
    pi = pl.program_id(2)
    ki = pl.program_id(3)
    last_k = pl.num_programs(3) - 1

    @pl.when(jnp.logical_and(pi == 0, ki == 0))
    def _zero_stats():
        sum_ref[...] = jnp.zeros_like(sum_ref)
        ssq_ref[...] = jnp.zeros_like(ssq_ref)

    partial = jnp.dot(p_ref[...], w_ref[...], preferred_element_type=jnp.float32)

    @pl.when(ki == 0)
    def _init_acc():
        acc_ref[...] = partial

    @pl.when(ki != 0)
    def _accum():
        acc_ref[...] += partial

    @pl.when(ki == last_k)
    def _finalize():
        tp, to = acc_ref.shape
        # Column sums on the XLU (sublane reduce) -- MXU stays free for the main loop.
        # Chunked over rows so only ~chunk x TO f32 is live at once (no regfile spill).
        s = jnp.zeros((1, to), jnp.float32)
        ss = jnp.zeros((1, to), jnp.float32)
        for c0 in range(0, tp, _STAT_CHUNK):
            sz = min(_STAT_CHUNK, tp - c0)
            y = acc_ref[pl.ds(c0, sz), :]
            conv_ref[pl.ds(c0, sz), :] = y.astype(conv_ref.dtype)
            s = s + jnp.sum(y, axis=0, keepdims=True)
            ss = ss + jnp.sum(y * y, axis=0, keepdims=True)
        sum_ref[...] += s
        ssq_ref[...] += ss


# --------------------------------------------------------------------------- #
# Phase 2: InstanceNorm (affine) + LeakyReLU (+ optional in-kernel transpose)  #
# --------------------------------------------------------------------------- #
def _norm_lrelu_kernel(conv_ref, sum_ref, ssq_ref, g_ref, b_ref, o_ref, *,
                       inv_p, transpose_out):
    y = conv_ref[...].astype(jnp.float32)                   # (TP, TO2)
    mean = sum_ref[...] * inv_p                             # (1, TO2)
    var = jnp.maximum(ssq_ref[...] * inv_p - mean * mean, 0.0)
    scale = g_ref[...] * jax.lax.rsqrt(var + EPS)           # (1, TO2)
    shift = b_ref[...] - mean * scale                       # (1, TO2)
    z = y * scale + shift
    z = jnp.where(z >= 0, z, NEG_SLOPE * z)
    if transpose_out:
        # Emit (TO2, TP) blocks of an (N, O_pad, P_pad) array -> no host transpose.
        o_ref[...] = z.T.astype(o_ref.dtype)
    else:
        o_ref[...] = z.astype(o_ref.dtype)


# --------------------------------------------------------------------------- #
# Host wrapper                                                                 #
# --------------------------------------------------------------------------- #
def cnn_block_forward(x, weight, gamma, beta, stride=STRIDE, *,
                      matmul_dtype=jnp.bfloat16,
                      tile_p=512, tile_k=4096, tile_o=256,
                      channels_last=False):
    """x: (N, C, H, W); weight: (O, C, KH, KW); gamma/beta: (O,)."""
    N, C, H, W = x.shape
    O = weight.shape[0]
    H_out = (H - KH) // stride + 1
    W_out = (W - KW) // stride + 1
    P = H_out * W_out
    K = C * KH * KW

    # --- im2col glue, built directly in the matmul dtype (halves HBM traffic of the
    #     patch matrix, the largest intermediate).  See TODO(synk) above. ------------
    x_mm = x.astype(matmul_dtype)
    cols = []
    for kh in range(KH):
        for kw in range(KW):
            cols.append(
                x_mm[:, :, kh:kh + stride * H_out:stride, kw:kw + stride * W_out:stride]
            )  # (N, C, H_out, W_out)
    patches = jnp.stack(cols, axis=2)                        # (N, C, KH*KW, Ho, Wo)
    patches = patches.transpose(0, 3, 4, 1, 2).reshape(N, P, K)

    # --- pad to TPU-friendly shapes --------------------------------------------------
    # Lane dims (K, O) -> multiples of 128; P tiles -> multiples of 16 (bf16 sublanes).
    O_pad = _round_up(O, 128)
    if O_pad > tile_o:
        O_pad = _round_up(O_pad, tile_o)
        TO = tile_o
    else:
        TO = O_pad

    K_pad = _round_up(K, 128)
    if K_pad > tile_k:
        K_pad = _round_up(K_pad, tile_k)
        TK = tile_k
    else:
        TK = K_pad            # single K block: weights stay resident across the P loop

    P16 = _round_up(P, 16)
    if P16 > tile_p:
        P_pad = _round_up(P16, tile_p)
        TP = tile_p
    else:
        P_pad = P16
        TP = P16

    patches = jnp.pad(patches, ((0, 0), (0, P_pad - P), (0, K_pad - K)))

    w_mat = weight.reshape(O, K).T                           # (K, O)
    w_mat = jnp.pad(w_mat, ((0, K_pad - K), (0, O_pad - O))).astype(matmul_dtype)

    g_row = jnp.pad(gamma.astype(jnp.float32).reshape(1, O), ((0, 0), (0, O_pad - O)))
    b_row = jnp.pad(beta.astype(jnp.float32).reshape(1, O), ((0, 0), (0, O_pad - O)))

    n_o = O_pad // TO
    n_p = P_pad // TP
    n_k = K_pad // TK

    # --- phase 1: conv + per-channel statistics --------------------------------------
    conv, csum, cssq = pl.pallas_call(
        _conv_stats_kernel,
        out_shape=(
            jax.ShapeDtypeStruct((N, P_pad, O_pad), matmul_dtype),   # conv output
            jax.ShapeDtypeStruct((N, 1, O_pad), jnp.float32),        # sum
            jax.ShapeDtypeStruct((N, 1, O_pad), jnp.float32),        # sum of squares
        ),
        grid_spec=pltpu.PrefetchScalarGridSpec(
            num_scalar_prefetch=0,
            grid=(N, n_o, n_p, n_k),
            in_specs=[
                pl.BlockSpec((None, TP, TK), lambda n, oi, pi, ki: (n, pi, ki)),
                pl.BlockSpec((TK, TO), lambda n, oi, pi, ki: (ki, oi)),
            ],
            out_specs=(
                pl.BlockSpec((None, TP, TO), lambda n, oi, pi, ki: (n, pi, oi)),
                pl.BlockSpec((None, 1, TO), lambda n, oi, pi, ki: (n, 0, oi)),
                pl.BlockSpec((None, 1, TO), lambda n, oi, pi, ki: (n, 0, oi)),
            ),
            scratch_shapes=[pltpu.VMEM((TP, TO), jnp.float32)],
        ),
        compiler_params=pltpu.CompilerParams(
            dimension_semantics=("parallel", "parallel", "arbitrary", "arbitrary"),
            vmem_limit_bytes=_VMEM_LIMIT),
    )(patches, w_mat)

    # --- phase 2: normalize + affine + LeakyReLU --------------------------------------
    # Single O block when it fits (fewer grid steps; gamma/beta/stats loaded once per
    # (n, pi)); otherwise fall back to 256/128-wide O tiles.
    if O_pad <= 512:
        TO2 = O_pad
    elif O_pad % 256 == 0:
        TO2 = 256
    else:
        TO2 = 128
    n_o2 = O_pad // TO2

    transpose_out = not channels_last
    if transpose_out:
        out_shape2 = jax.ShapeDtypeStruct((N, O_pad, P_pad), x.dtype)
        out_spec2 = pl.BlockSpec((None, TO2, TP), lambda n, oi, pi: (n, oi, pi))
    else:
        out_shape2 = jax.ShapeDtypeStruct((N, P_pad, O_pad), x.dtype)
        out_spec2 = pl.BlockSpec((None, TP, TO2), lambda n, oi, pi: (n, pi, oi))

    out_padded = pl.pallas_call(
        functools.partial(_norm_lrelu_kernel, inv_p=1.0 / P,
                          transpose_out=transpose_out),
        out_shape=out_shape2,
        grid_spec=pltpu.PrefetchScalarGridSpec(
            num_scalar_prefetch=0,
            grid=(N, n_o2, n_p),
            in_specs=[
                pl.BlockSpec((None, TP, TO2), lambda n, oi, pi: (n, pi, oi)),
                pl.BlockSpec((None, 1, TO2), lambda n, oi, pi: (n, 0, oi)),
                pl.BlockSpec((None, 1, TO2), lambda n, oi, pi: (n, 0, oi)),
                pl.BlockSpec((1, TO2), lambda n, oi, pi: (0, oi)),
                pl.BlockSpec((1, TO2), lambda n, oi, pi: (0, oi)),
            ],
            out_specs=out_spec2,
        ),
        compiler_params=pltpu.CompilerParams(
            dimension_semantics=("parallel", "parallel", "parallel"),
            vmem_limit_bytes=_VMEM_LIMIT),
    )(conv, csum, cssq, g_row, b_row)

    if channels_last:
        # Channel-last / lane-dense layout for a fused consumer.
        return out_padded[:, :P, :O].reshape(N, H_out, W_out, O)
    # Kernel already emitted (N, O_pad, P_pad); just slice + free reshape to NCHW.
    return out_padded[:, :O, :P].reshape(N, O, H_out, W_out)


# --------------------------------------------------------------------------- #
# Plain-JAX reference (correctness check only)                                 #
# --------------------------------------------------------------------------- #
def _reference_forward(x, weight, gamma, beta, stride=STRIDE):
    y = jax.lax.conv_general_dilated(
        x, weight, window_strides=(stride, stride), padding="VALID",
        dimension_numbers=("NCHW", "OIHW", "NCHW"))
    mean = jnp.mean(y, axis=(2, 3), keepdims=True)
    var = jnp.mean((y - mean) ** 2, axis=(2, 3), keepdims=True)
    y_hat = (y - mean) * jax.lax.rsqrt(var + EPS)
    z = y_hat * gamma.reshape(1, -1, 1, 1) + beta.reshape(1, -1, 1, 1)
    return jnp.where(z >= 0, z, NEG_SLOPE * z)


if __name__ == "__main__":
    N, C_in, H, W = 2, 4, 16, 16
    C_out = 8

    key = jax.random.PRNGKey(0)
    kx, kw_, kg, kb = jax.random.split(key, 4)

    x = jax.random.normal(kx, (N, C_in, H, W), dtype=jnp.float32)
    weight = 0.1 * jax.random.normal(kw_, (C_out, C_in, KH, KW), dtype=jnp.float32)
    # InstanceNorm2d(affine=True) default init is gamma=1, beta=0; perturb slightly
    # (deterministically) to exercise the affine path.
    gamma = jnp.ones((C_out,), jnp.float32) + 0.01 * jax.random.normal(kg, (C_out,))
    beta = 0.01 * jax.random.normal(kb, (C_out,), dtype=jnp.float32)

    ref = jax.block_until_ready(_reference_forward(x, weight, gamma, beta))

    # Exact-semantics check: f32 matmul path, tight tolerance.
    out_f32 = jax.block_until_ready(
        cnn_block_forward(x, weight, gamma, beta, matmul_dtype=jnp.float32))
    assert out_f32.shape == (N, C_out, 7, 7), out_f32.shape
    assert jnp.allclose(out_f32, ref, atol=1e-4, rtol=1e-4), \
        float(jnp.max(jnp.abs(out_f32 - ref)))

    # Fast path: bf16 MXU matmul with f32 accumulation/statistics (looser tolerance
    # due to bf16 rounding of the conv stream).
    out_bf16 = jax.block_until_ready(cnn_block_forward(x, weight, gamma, beta))
    assert out_bf16.shape == (N, C_out, 7, 7), out_bf16.shape
    assert jnp.allclose(out_bf16, ref, atol=3e-2, rtol=3e-2), \
        float(jnp.max(jnp.abs(out_bf16 - ref)))

    # Channels-last path (no transpose anywhere) for a fused consumer.
    out_nhwc = jax.block_until_ready(
        cnn_block_forward(x, weight, gamma, beta, channels_last=True))
    assert out_nhwc.shape == (N, 7, 7, C_out), out_nhwc.shape
    assert jnp.allclose(out_nhwc.transpose(0, 3, 1, 2), ref, atol=3e-2, rtol=3e-2)

    print("KERNEL_OK")
</pallas_src>

<mosaic_0001>
module attributes {stable_mosaic.version = 11 : i64} {
  func.func @_conv_stats_kernel(%arg0: i32, %arg1: i32, %arg2: i32, %arg3: i32, %arg4: memref<1x64x128xf32, #tpu.memory_space<vmem>>, %arg5: memref<128x128xf32, #tpu.memory_space<vmem>>, %arg6: memref<1x64x128xf32, #tpu.memory_space<vmem>>, %arg7: memref<1x1x128xf32, #tpu.memory_space<vmem>>, %arg8: memref<1x1x128xf32, #tpu.memory_space<vmem>>, %arg9: memref<64x128xf32, #tpu.memory_space<vmem>>) attributes {dimension_semantics = [#tpu.dimension_semantics<parallel>, #tpu.dimension_semantics<parallel>, #tpu.dimension_semantics<arbitrary>, #tpu.dimension_semantics<arbitrary>], iteration_bounds = array<i64: 2, 1, 1, 1>, scalar_prefetch = 0 : i64, scratch_operands = 1 : i64, tpu.core_type = #tpu.core_type<tc>, window_params = [{transform_indices = @transform_0, window_bounds = array<i64: 1, 64, 128>}, {transform_indices = @transform_1, window_bounds = array<i64: 128, 128>}, {transform_indices = @transform_2, window_bounds = array<i64: 1, 64, 128>}, {transform_indices = @transform_3, window_bounds = array<i64: 1, 1, 128>}, {transform_indices = @transform_4, window_bounds = array<i64: 1, 1, 128>}]} {
    %c0_i32 = arith.constant 0 : i32
    %0 = arith.cmpi eq, %arg2, %c0_i32 : i32
    %c0_i32_0 = arith.constant 0 : i32
    %1 = arith.cmpi eq, %arg3, %c0_i32_0 : i32
    %2 = arith.andi %0, %1 : i1
    %3 = arith.extui %2 : i1 to i32
    %c0_i32_1 = arith.constant 0 : i32
    %4 = arith.cmpi ne, %3, %c0_i32_1 : i32
    scf.if %4 {
      %cst_12 = arith.constant 0.000000e+00 : f32
      %18 = vector.broadcast %cst_12 : f32 to vector<1x128xf32>
      %c0_13 = arith.constant 0 : index
      %c0_14 = arith.constant 0 : index
      %c0_15 = arith.constant 0 : index
      %19 = vector.load %arg7[%c0_13, %c0_14, %c0_15] : memref<1x1x128xf32, #tpu.memory_space<vmem>>, vector<1x1x128xf32>
      %20 = vector.shape_cast %19 : vector<1x1x128xf32> to vector<1x128xf32>
      %21 = vector.shape_cast %18 : vector<1x128xf32> to vector<1x1x128xf32>
      tpu.vector_store %arg7[%c0_13, %c0_14, %c0_15], %21 {strides = array<i32>} : memref<1x1x128xf32, #tpu.memory_space<vmem>>, vector<1x1x128xf32>,
      %cst_16 = arith.constant 0.000000e+00 : f32
      %22 = vector.broadcast %cst_16 : f32 to vector<1x128xf32>
      %c0_17 = arith.constant 0 : index
      %c0_18 = arith.constant 0 : index
      %c0_19 = arith.constant 0 : index
      %23 = vector.load %arg8[%c0_17, %c0_18, %c0_19] : memref<1x1x128xf32, #tpu.memory_space<vmem>>, vector<1x1x128xf32>
      %24 = vector.shape_cast %23 : vector<1x1x128xf32> to vector<1x128xf32>
      %25 = vector.shape_cast %22 : vector<1x128xf32> to vector<1x1x128xf32>
      tpu.vector_store %arg8[%c0_17, %c0_18, %c0_19], %25 {strides = array<i32>} : memref<1x1x128xf32, #tpu.memory_space<vmem>>, vector<1x1x128xf32>,
    } else {
    }
    %c0 = arith.constant 0 : index
    %c0_2 = arith.constant 0 : index
    %c0_3 = arith.constant 0 : index
    %5 = vector.load %arg4[%c0, %c0_2, %c0_3] : memref<1x64x128xf32, #tpu.memory_space<vmem>>, vector<1x64x128xf32>
    %6 = vector.shape_cast %5 : vector<1x64x128xf32> to vector<64x128xf32>
    %c0_4 = arith.constant 0 : index
    %c0_5 = arith.constant 0 : index
    %7 = vector.load %arg5[%c0_4, %c0_5] : memref<128x128xf32, #tpu.memory_space<vmem>>, vector<128x128xf32>
    %cst = arith.constant dense<0.000000e+00> : vector<64x128xf32>
    %8 = tpu.matmul %6, %7, %cst {dimension_numbers = #tpu.dot_dimension_numbers<[1], [0], [0], [1], [0, 0, 1, 1], [], []>} : vector<64x128xf32>, vector<128x128xf32>, vector<64x128xf32> -> vector<64x128xf32>
    %c0_i32_6 = arith.constant 0 : i32
    %9 = arith.cmpi eq, %arg3, %c0_i32_6 : i32
    %10 = arith.extui %9 : i1 to i32
    %c0_i32_7 = arith.constant 0 : i32
    %11 = arith.cmpi ne, %10, %c0_i32_7 : i32
    scf.if %11 {
      %c0_12 = arith.constant 0 : index
      %c0_13 = arith.constant 0 : index
      %18 = vector.load %arg9[%c0_12, %c0_13] : memref<64x128xf32, #tpu.memory_space<vmem>>, vector<64x128xf32>
      tpu.vector_store %arg9[%c0_12, %c0_13], %8 {strides = array<i32>} : memref<64x128xf32, #tpu.memory_space<vmem>>, vector<64x128xf32>,
    } else {
    }
    %c0_i32_8 = arith.constant 0 : i32
    %12 = arith.cmpi ne, %arg3, %c0_i32_8 : i32
    %13 = arith.extui %12 : i1 to i32
    %c0_i32_9 = arith.constant 0 : i32
    %14 = arith.cmpi ne, %13, %c0_i32_9 : i32
    scf.if %14 {
      %c0_12 = arith.constant 0 : index
      %c0_13 = arith.constant 0 : index
      %18 = vector.load %arg9[%c0_12, %c0_13] : memref<64x128xf32, #tpu.memory_space<vmem>>, vector<64x128xf32>
      %19 = arith.addf %18, %8 : vector<64x128xf32>
      %c0_14 = arith.constant 0 : index
      %c0_15 = arith.constant 0 : index
      %20 = vector.load %arg9[%c0_14, %c0_15] : memref<64x128xf32, #tpu.memory_space<vmem>>, vector<64x128xf32>
      tpu.vector_store %arg9[%c0_14, %c0_15], %19 {strides = array<i32>} : memref<64x128xf32, #tpu.memory_space<vmem>>, vector<64x128xf32>,
    } else {
    }
    %c0_i32_10 = arith.constant 0 : i32
    %15 = arith.cmpi eq, %arg3, %c0_i32_10 : i32
    %16 = arith.extui %15 : i1 to i32
    %c0_i32_11 = arith.constant 0 : i32
    %17 = arith.cmpi ne, %16, %c0_i32_11 : i32
    scf.if %17 {
      %cst_12 = arith.constant 0.000000e+00 : f32
      %18 = vector.broadcast %cst_12 : f32 to vector<1x128xf32>
      %cst_13 = arith.constant 0.000000e+00 : f32
      %19 = vector.broadcast %cst_13 : f32 to vector<1x128xf32>
      %c0_14 = arith.constant 0 : index
      %c0_15 = arith.constant 0 : index
      %20 = vector.load %arg9[%c0_14, %c0_15] : memref<64x128xf32, #tpu.memory_space<vmem>>, vector<64x128xf32>
      %c0_16 = arith.constant 0 : index
      %c0_17 = arith.constant 0 : index
      %c0_18 = arith.constant 0 : index
      %21 = vector.load %arg6[%c0_16, %c0_17, %c0_18] : memref<1x64x128xf32, #tpu.memory_space<vmem>>, vector<1x64x128xf32>
      %22 = vector.shape_cast %21 : vector<1x64x128xf32> to vector<64x128xf32>
      %23 = vector.shape_cast %20 : vector<64x128xf32> to vector<1x64x128xf32>
      tpu.vector_store %arg6[%c0_16, %c0_17, %c0_18], %23 {strides = array<i32>} : memref<1x64x128xf32, #tpu.memory_space<vmem>>, vector<1x64x128xf32>,
      %cst_19 = arith.constant dense<0.000000e+00> : vector<128xf32>
      %24 = vector.multi_reduction <add>, %20, %cst_19 [0] : vector<64x128xf32> to vector<128xf32>
      %25 = vector.shape_cast %24 : vector<128xf32> to vector<1x128xf32>
      %26 = arith.addf %18, %25 : vector<1x128xf32>
      %27 = arith.mulf %20, %20 : vector<64x128xf32>
      %cst_20 = arith.constant dense<0.000000e+00> : vector<128xf32>
      %28 = vector.multi_reduction <add>, %27, %cst_20 [0] : vector<64x128xf32> to vector<128xf32>
      %29 = vector.shape_cast %28 : vector<128xf32> to vector<1x128xf32>
      %30 = arith.addf %19, %29 : vector<1x128xf32>
      %c0_21 = arith.constant 0 : index
      %c0_22 = arith.constant 0 : index
      %c0_23 = arith.constant 0 : index
      %31 = vector.load %arg7[%c0_21, %c0_22, %c0_23] : memref<1x1x128xf32, #tpu.memory_space<vmem>>, vector<1x1x128xf32>
      %32 = vector.shape_cast %31 : vector<1x1x128xf32> to vector<1x128xf32>
      %33 = arith.addf %32, %26 : vector<1x128xf32>
      %c0_24 = arith.constant 0 : index
      %c0_25 = arith.constant 0 : index
      %c0_26 = arith.constant 0 : index
      %34 = vector.load %arg7[%c0_24, %c0_25, %c0_26] : memref<1x1x128xf32, #tpu.memory_space<vmem>>, vector<1x1x128xf32>
      %35 = vector.shape_cast %34 : vector<1x1x128xf32> to vector<1x128xf32>
      %36 = vector.shape_cast %33 : vector<1x128xf32> to vector<1x1x128xf32>
      tpu.vector_store %arg7[%c0_24, %c0_25, %c0_26], %36 {strides = array<i32>} : memref<1x1x128xf32, #tpu.memory_space<vmem>>, vector<1x1x128xf32>,
      %c0_27 = arith.constant 0 : index
      %c0_28 = arith.constant 0 : index
      %c0_29 = arith.constant 0 : index
      %37 = vector.load %arg8[%c0_27, %c0_28, %c0_29] : memref<1x1x128xf32, #tpu.memory_space<vmem>>, vector<1x1x128xf32>
      %38 = vector.shape_cast %37 : vector<1x1x128xf32> to vector<1x128xf32>
      %39 = arith.addf %38, %30 : vector<1x128xf32>
      %c0_30 = arith.constant 0 : index
      %c0_31 = arith.constant 0 : index
      %c0_32 = arith.constant 0 : index
      %40 = vector.load %arg8[%c0_30, %c0_31, %c0_32] : memref<1x1x128xf32, #tpu.memory_space<vmem>>, vector<1x1x128xf32>
      %41 = vector.shape_cast %40 : vector<1x1x128xf32> to vector<1x128xf32>
      %42 = vector.shape_cast %39 : vector<1x128xf32> to vector<1x1x128xf32>
      tpu.vector_store %arg8[%c0_30, %c0_31, %c0_32], %42 {strides = array<i32>} : memref<1x1x128xf32, #tpu.memory_space<vmem>>, vector<1x1x128xf32>,
    } else {
    }
    return
  }
  func.func @transform_0(%arg0: i32, %arg1: i32, %arg2: i32, %arg3: i32) -> (i32, i32, i32) {
    %c0_i32 = arith.constant 0 : i32
    return %arg0, %arg2, %arg3 : i32, i32, i32
  }
  func.func @transform_1(%arg0: i32, %arg1: i32, %arg2: i32, %arg3: i32) -> (i32, i32) {
    %c0_i32 = arith.constant 0 : i32
    return %arg3, %arg1 : i32, i32
  }
  func.func @transform_2(%arg0: i32, %arg1: i32, %arg2: i32, %arg3: i32) -> (i32, i32, i32) {
    %c0_i32 = arith.constant 0 : i32
    return %arg0, %arg2, %arg1 : i32, i32, i32
  }
  func.func @transform_3(%arg0: i32, %arg1: i32, %arg2: i32, %arg3: i32) -> (i32, i32, i32) {
    %c0_i32 = arith.constant 0 : i32
    %c0_i32_0 = arith.constant 0 : i32
    return %arg0, %c0_i32, %arg1 : i32, i32, i32
  }
  func.func @transform_4(%arg0: i32, %arg1: i32, %arg2: i32, %arg3: i32) -> (i32, i32, i32) {
    %c0_i32 = arith.constant 0 : i32
    %c0_i32_0 = arith.constant 0 : i32
    return %arg0, %c0_i32, %arg1 : i32, i32, i32
  }
}

</mosaic_0001>

<bundles_post_ra>
// kernel: tpu_custom_call.1
= control target key start
LH: loop header
LB: loop body
LE: loop exit
PB: predicated region body
PF: predicated region fallthrough
CT: control target
= control target key end

     0   :  { %10 = vsyncpa [#allocation4], 0  ;;  %s1537_s0 = inlined_call_operand.hbm [shape: f32[2,64,128], index: 0, kind: input, shape index: {}]   ;;  %s1538_s1 = inlined_call_operand.hbm [shape: f32[128,128], index: 1, kind: input, shape index: {}]   ;;  %s1539_s2 = inlined_call_operand.hbm [shape: f32[2,64,128], index: 2, kind: output, shape index: {0}]   ;;  %s1540_s3 = inlined_call_operand.hbm [shape: f32[2,1,128], index: 3, kind: output, shape index: {1}]   ;;  %s1541_s4 = inlined_call_operand.hbm [shape: f32[2,1,128], index: 4, kind: output, shape index: {2}]  }
   0x1   :  { %12 = vsyncpa [#allocation4 + $0x1], 0 }
   0x2   :  { %13 = vsyncpa [#allocation7], 0 }
   0x3   :  { %14 = vsyncpa [#allocation5], 0 }
   0x4   :  { %16 = vsyncpa [#allocation5 + $0x1], 0 }
   0x5   :  { %17 = vsyncpa [#allocation10], 0 }
   0x6   :  { %19 = vsyncpa [#allocation10 + $0x1], 0  ;;  %s1222_s15 = smov 0   ;;  %s1224_s16 = smov 0  }
   0x7   :  { %s1226_s17 = smov 0   ;;  %s1228_s18 = smov 0  }
   0x8   :  { %s1230_s19 = smov 0   ;;  %s1232_s20 = smov 0  }
   0x9 LB: > { %s1253_s21 = sadd.s32 4294967295, %s1185_s20   ;;  %s1545_s22 = sadd.s32 4294967294, %s1185_s20   ;;  %s1185_s20 = sphi %s1232_s20, %s25_s20   ;;  %s1181_s19 = sphi %s1230_s19, %s1565_s19   ;;  %s1177_s18 = sphi %s1228_s18, %s1564_s18   ;;  %s1173_s17 = sphi %s1226_s17, %s1563_s17   ;;  %s1169_s16 = sphi %s1224_s16, %s1562_s16   ;;  %s1165_s15 = sphi %s1222_s15, %s1561_s15  }
   0xa   : > { %p75_p0 = scmp.ne.s32.totalorder %s1169_s16, %s1165_s15  ;;  %p1542_p1 = scmp.eq.s32.totalorder %s1253_s21, 0 }
   0xb   : > { %p137_p3 = scmp.eq.s32.totalorder %s1545_s22, 1  ;;  %p758_p5 = scmp.ge.s32.totalorder %s1185_s20, 1 }
   0xc   : > { %p1264_p4 = por %p1542_p1, %p75_p0  ;;  %p200_p7 = scmp.lt.s32.totalorder %s1185_s20, 3 }
   0xd   : > { %p1269_p6 = por %p137_p3, %p75_p0  ;;  %s1187_s26 = smov [#allocation6]  }
   0xe   : > { %s1546_s23 = scalar_select %p1264_p4, 1, 0 }
   0xf   : > { %s1547_s24 = scalar_select %p1269_p6, 1, 0 }
  0x10   : > { %p1274_p8 = pnand %p758_p5, %p200_p7  ;;  %s216_s27 = sshll.u32 %s1187_s26, 4  ;;  %s217_s27 = int_to_ptr.vmem [resolvable:$true] %s216_s27 }
  0x11   : > { %s51_s29 = sadd.s32 1, %s1181_s19  ;;  %s981_s6 = scalar_lea.hbm %s1538_s1, 2048 }
  0x12   : > { %s1548_s25 = scalar_select %p1274_p8, 1, 0 }
  0x13   : > { %p905_p9 = pneg %p1274_p8  ;;  %p982_p12 = scmp.ne.s32.totalorder %s1538_s1, %s981_s6 }
  0x14   : > { %p988_p5 = scmp.lt.u32.totalorder %s981_s6, %s1538_s1 }
  0x15   : > { %p1283_p11 = pnand %p905_p9, %p1542_p1 }
  0x17   : > { %p983_p13 = pneg %p1283_p11 }
  0x19   : > { %p984_p0 = pnand %p983_p13, %p982_p12 }
  0x1b   : > { %p985_p3 = pneg %p984_p0 }
  0x1d   : > { %p990_p7 = pnand %p988_p5, %p985_p3 }
  0x1f   : > { %993 = shalt.err (!%p990_p7)
}
  0x20   : > { %s994_s11 = scalar_lea.vmem %s217_s27, 2048  ;;  %p1002_p2 = scmp.lt.s32.totalorder %s217_s27, %s217_s27 }
  0x21   : > { %p995_p9 = scmp.ne.s32.totalorder %s217_s27, %s994_s11  ;;  %p1003_p6 = scmp.lt.s32.totalorder %s994_s11, %s994_s11 }
  0x23   : > { %p997_p10 = pnand %p995_p9, %p983_p13  ;;  %p1004_p4 = por %p1003_p6, %p1002_p2 }
  0x25   : > { %p998_p1 = pneg %p997_p10 }
  0x27   : > { %p1005_p8 = pnand %p1004_p4, %p998_p1 }
  0x29   : > { %1008 = shalt.err (!%p1005_p8)
}
  0x2a   : > { %s1188_s12 = smov 128   ;;  %s1189_s13 = smov 8  }
  0x2b   : > { %908 = dma.hbm_to_vmem [thread:$0]  (!%p1283_p11), %s1538_s1, 2048, %s217_s27, [#allocation7], %s1188_s12, %s1188_s12, %s1189_s13  }
  0x2c   : > { %p53_p1 = scmp.ge.s32.totalorder %s51_s29, 2  ;;  %s62_s30 = sadd.s32 1, %s1173_s17 }
  0x2d   : > { %p69_p2 = scmp.ne.s32.totalorder %s1173_s17, %s1169_s16  ;;  %p70_p4 = scmp.eq.s32.totalorder %s1185_s20, 0 }
  0x2e   : > { %s1567_s29 = smov (%p53_p1, %s51_s29), 0  ;;  %p1551_p8 = scmp.eq.s32.totalorder %s1253_s21, 1 }
  0x2f   : > { %p1313_p6 = por %p70_p4, %p69_p2  ;;  %s55_s6 = ssub.s32 %s1181_s19, %s1567_s29 }
  0x30   : > { %p1319_p10 = por %p1551_p8, %p69_p2  ;;  %p924_p12 = scmp.lt.s32.totalorder %s1185_s20, 2 }
  0x31   : > { %p60_p11 = scmp.eq.s32.totalorder %s55_s6, 0  ;;  %s230_s27 = sand.u32 1, %s1173_s17  }
  0x32   : > { %s761_s7 = sshll.u32 %s230_s27, 6  ;;  %s775_s9 = sshll.u32 %s1181_s19, 10 }
  0x33   : > { %s1328_s8 = scalar_select %p60_p11, %s1173_s17, %s62_s30  }
  0x34   : > { %s1334_s14 = scalar_lea.hbm %s1537_s0, %s775_s9  ;;  %s234_s26 = scalar_lea.vmem [#allocation3], %s761_s7 }
  0x35   : > { %s244_s22 = sshll.u32 %s234_s26, 4  ;;  %p1340_p13 = pnand %p924_p12, %p1313_p6  ;;  %s1336_s22 = int_to_ptr.vmem [resolvable:$true] %s244_s22 }
  0x36   : > { %s1344_s30 = scalar_lea.sflag [#allocation4], %s230_s27  ;;  %s1009_s10 = scalar_lea.hbm %s1334_s14, 1024 }
  0x37   : > { %p1010_p0 = scmp.ne.s32.totalorder %s1334_s14, %s1009_s10  ;;  %p1011_p3 = pneg %p1340_p13 }
  0x38   : > { %s1014_s5 = scalar_lea.hbm %s1537_s0, 2048  ;;  %p1015_p9 = scmp.lt.u32.totalorder %s1334_s14, %s1537_s0 }
  0x39   : > { %p1012_p5 = pnand %p1011_p3, %p1010_p0  ;;  %p1016_p1 = scmp.lt.u32.totalorder %s1014_s5, %s1009_s10 }
  0x3a   : > { %p1018_p4 = scmp.lt.u32.totalorder %s1009_s10, %s1334_s14 }
  0x3b   : > { %p1013_p7 = pneg %p1012_p5  ;;  %p1017_p2 = por %p1016_p1, %p1015_p9 }
  0x3d   : > { %p1019_p6 = por %p1018_p4, %p1017_p2 }
  0x3f   : > { %p1020_p8 = pnand %p1019_p6, %p1013_p7 }
  0x41   : > { %1023 = shalt.err (!%p1020_p8)
}
  0x42   : > { %s1024_s27 = scalar_lea.vmem %s1336_s22, 1024  ;;  %s1190_s7 = smov [#allocation3]  }
  0x43   : > { %p1025_p12 = scmp.ne.s32.totalorder %s1336_s22, %s1024_s27  ;;  %s1029_s9 = sshll.u32 %s1190_s7, 4  ;;  %s1030_s9 = int_to_ptr.vmem [resolvable:$false] %s1029_s9 }
  0x44   : > { %s1031_s11 = scalar_lea.vmem %s1030_s9, 2048  ;;  %p1032_p5 = scmp.lt.s32.totalorder %s1336_s22, %s1030_s9 }
  0x45   : > { %p1027_p11 = pnand %p1025_p12, %p1011_p3  ;;  %p1033_p9 = scmp.lt.s32.totalorder %s1031_s11, %s1024_s27 }
  0x47   : > { %p1028_p0 = pneg %p1027_p11  ;;  %p1034_p1 = por %p1033_p9, %p1032_p5 }
  0x49   : > { %p1035_p2 = pnand %p1034_p1, %p1028_p0 }
  0x4b   : > { %1038 = shalt.err (!%p1035_p2)
}
  0x4c   : > { %912 = dma.hbm_to_vmem [thread:$0]  (!%p1340_p13), %s1334_s14, 1024, %s1336_s22, %s1344_s30, %s1188_s12, %s1188_s12, %s1189_s13  }
  0x4d   : > { %p1554_p3 = scmp.ne.s32.totalorder %s1548_s25, 0 }
  0x4e   : > { %s1378_s10 = sand.u32 (!%p1554_p3), 1, %s1169_s16   ;;  %p1555_p7 = scmp.ne.s32.totalorder (!%p1554_p3), %s1546_s23, 0 }
  0x4f   : > { %256 = sbr.rel (%p1554_p3) target bundleno = 415 (0x19f), region = 28  ;;  %s765_s5 = sshll.u32 (!%p1554_p3), %s1378_s10, 6 }
  0x50   : > { %s259_s26 = scalar_lea.sflag (!%p1554_p3), [#allocation4], %s1378_s10  ;;  %s1384_s6 = scalar_lea.vmem (!%p1554_p3), [#allocation3], %s765_s5 }
  0x56   : > { %1148 = dma.done.wait (%p1555_p7), %s259_s26, 1024  }
  0x57   : > { %1150 = vsyncadd (%p1555_p7), %s259_s26, 4294966272  ;;  %p1556_p13 = scmp.eq.s32.totalorder %s1253_s21, 0 }
  0x59   : > { %1152 = dma.done.wait (%p1556_p13), [#allocation7], 2048   ;;  %p1557_p4 = pmov %p1556_p13 }
  0x5a   : > { %v318_v0 = vld [vmem:[#allocation6] sm:$0xff]  ;;  %v319_v1 = vld [vmem:[#allocation6 + $0x8] sm:$0xff]  ;;  %v320_v2 = vld [vmem:[#allocation6 + $0x10] sm:$0xff]  ;;  %s1403_s22 = scalar_lea.vmem [#allocation9], %s1378_s10  ;;  %v1191_v32 = vmov 0.0   ;;  %s1407_s23 = scalar_lea.vmem [#allocation11], %s1378_s10 }
  0x5b   : > { %1154 = vsyncadd (%p1557_p4), [#allocation7], 4294965248  ;;  %v845_v3 = vpack.c.bf16 %v319_v1, %v318_v0  ;;  %v321_v4 = vld [vmem:[#allocation6 + $0x18] sm:$0xff]  ;;  %v322_v6 = vld [vmem:[#allocation6 + $0x20] sm:$0xff]  ;;  %308 = vst [vmem:[%s1403_s22] sm:$0x1] %v1191_v32  ;;  %s286_s25 = scalar_lea.vmem [#allocation8], %s765_s5 }
  0x5c   : > { %v849_v5 = vpack.c.bf16 %v321_v4, %v320_v2  ;;  %v323_v7 = vld [vmem:[#allocation6 + $0x28] sm:$0xff]  ;;  %v310_v9 = vld [vmem:[%s1384_s6] sm:$0xff]  ;;  %v324_v10 = vld [vmem:[#allocation6 + $0x30] sm:$0xff]  ;;  %309 = vst [vmem:[%s1407_s23] sm:$0x1] %v1191_v32  ;;  %s564_s12 = sshll.u32 %s286_s25, 4  ;;  %s776_s13 = sshll.u32 %s1177_s18, 10  ;;  %s1413_s12 = int_to_ptr.vmem [resolvable:$true] %s564_s12 }
  0x5d   : > { %846 = vmatprep.subr.bf16.mxu0 %v845_v3  ;;  %877 = vmatprep.subr.bf16.mxu1 %v845_v3  ;;  %v853_v8 = vpack.c.bf16 %v323_v7, %v322_v6  ;;  %v325_v11 = vld [vmem:[#allocation6 + $0x38] sm:$0xff]  ;;  %v314_v12 = vld [vmem:[%s1384_s6 + $0x20] sm:$0xff]  ;;  %v327_v15 = vld [vmem:[#allocation6 + $0x48] sm:$0xff]  ;;  %s1418_s27 = scalar_lea.hbm %s1539_s2, %s776_s13  ;;  %s540_s7 = scalar_lea.sflag [#allocation5], %s1378_s10 }
  0x5e   : > { %848 = vmatpush3.bf16.msra.mxu0 %v845_v3  ;;  %885 = vmatpush3.bf16.msra.mxu1 %v845_v3  ;;  %v857_v13 = vpack.c.bf16 %v325_v11, %v324_v10  ;;  %v326_v14 = vld [vmem:[#allocation6 + $0x40] sm:$0xff]  ;;  %v328_v17 = vld [vmem:[#allocation6 + $0x50] sm:$0xff]  ;;  %v329_v18 = vld [vmem:[#allocation6 + $0x58] sm:$0xff]  ;;  %s1039_s9 = scalar_lea.vmem %s1413_s12, 1024  ;;  %s1192_s11 = smov [#allocation8]  }
  0x5f   : > { %850 = vmatprep.subr.bf16.mxu0 %v849_v5  ;;  %878 = vmatprep.subr.bf16.mxu1 %v849_v5  ;;  %v861_v16 = vpack.c.bf16 %v327_v15, %v326_v14  ;;  %v865_v19 = vpack.c.bf16 %v329_v18, %v328_v17  ;;  %v330_v20 = vld [vmem:[#allocation6 + $0x60] sm:$0xff]  ;;  %v331_v21 = vld [vmem:[#allocation6 + $0x68] sm:$0xff]  ;;  %v332_v23 = vld [vmem:[#allocation6 + $0x70] sm:$0xff]  ;;  %p1040_p6 = scmp.ne.s32.totalorder %s1413_s12, %s1039_s9  ;;  %s1043_s5 = sshll.u32 %s1192_s11, 4  ;;  %s1044_s5 = int_to_ptr.vmem [resolvable:$false] %s1043_s5 }
  0x60   : > { %833 = vmatprep.mubr.f32.mxu0 %v310_v9  ;;  %839 = vmatprep.mubr.f32.mxu1 %v314_v12  ;;  %v869_v22 = vpack.c.bf16 %v331_v21, %v330_v20  ;;  %v333_v24 = vld [vmem:[#allocation6 + $0x78] sm:$0xff]  ;;  %v311_v26 = vld [vmem:[%s1384_s6 + $0x8] sm:$0xff]  ;;  %v312_v28 = vld [vmem:[%s1384_s6 + $0x10] sm:$0xff]  ;;  %s1045_s26 = scalar_lea.vmem %s1044_s5, 2048  ;;  %p1046_p11 = scmp.lt.s32.totalorder %s1413_s12, %s1044_s5 }
  0x61   : > { %v873_v25 = vpack.c.bf16 %v333_v24, %v332_v23  ;;  %v315_v27 = vld [vmem:[%s1384_s6 + $0x28] sm:$0xff]  ;;  %v316_v29 = vld [vmem:[%s1384_s6 + $0x30] sm:$0xff]  ;;  %v313_v30 = vld [vmem:[%s1384_s6 + $0x18] sm:$0xff]  ;;  %p1041_p8 = pnand %p1040_p6, %p1319_p10  ;;  %p1047_p0 = scmp.lt.s32.totalorder %s1045_s26, %s1039_s9 }
  0x62   : > { %852 = vmatpush3.bf16.msra.mxu0 %v849_v5  ;;  %886 = vmatpush3.bf16.msra.mxu1 %v849_v5  ;;  %v317_v31 = vld [vmem:[%s1384_s6 + $0x38] sm:$0xff] }
  0x63   : > { %854 = vmatprep.subr.bf16.mxu0 %v853_v8  ;;  %879 = vmatprep.subr.bf16.mxu1 %v853_v8  ;;  %p1042_p12 = pneg %p1041_p8  ;;  %p1048_p5 = por %p1047_p0, %p1046_p11 }
  0x65   : > { %p1049_p9 = pnand %p1048_p5, %p1042_p12 }
  0x66   : > { %856 = vmatpush3.bf16.msra.mxu0 %v853_v8  ;;  %887 = vmatpush3.bf16.msra.mxu1 %v853_v8 }
  0x67   : > { %858 = vmatprep.subr.bf16.mxu0 %v857_v13  ;;  %880 = vmatprep.subr.bf16.mxu1 %v857_v13 }
  0x6a   : > { %860 = vmatpush3.bf16.msra.mxu0 %v857_v13  ;;  %888 = vmatpush3.bf16.msra.mxu1 %v857_v13 }
  0x6b   : > { %862 = vmatprep.subr.bf16.mxu0 %v861_v16  ;;  %881 = vmatprep.subr.bf16.mxu1 %v861_v16 }
  0x6e   : > { %864 = vmatpush3.bf16.msra.mxu0 %v861_v16  ;;  %889 = vmatpush3.bf16.msra.mxu1 %v861_v16 }
  0x6f   : > { %866 = vmatprep.subr.bf16.mxu0 %v865_v19  ;;  %882 = vmatprep.subr.bf16.mxu1 %v865_v19 }
  0x72   : > { %868 = vmatpush3.bf16.msra.mxu0 %v865_v19  ;;  %890 = vmatpush3.bf16.msra.mxu1 %v865_v19 }
  0x73   : > { %870 = vmatprep.subr.bf16.mxu0 %v869_v22  ;;  %883 = vmatprep.subr.bf16.mxu1 %v869_v22 }
  0x76   : > { %872 = vmatpush3.bf16.msra.mxu0 %v869_v22  ;;  %891 = vmatpush3.bf16.msra.mxu1 %v869_v22 }
  0x77   : > { %874 = vmatprep.subr.bf16.mxu0 %v873_v25  ;;  %884 = vmatprep.subr.bf16.mxu1 %v873_v25 }
  0x7a   : > { %876 = vmatpush3.bf16.msra.mxu0 %v873_v25  ;;  %892 = vmatpush3.bf16.msra.mxu1 %v873_v25 }
  0x7d   : > { %834 = vmatmul.mubr.f32.vlgmr.msra.gmra.mrb[0].mxu0 %v311_v26  ;;  %840 = vmatmul.mubr.f32.vlgmr.msra.gmra.mrb[0].mxu1 %v315_v27 }
  0x7e   : > { %836 = vmatprep.mubr.f32.mxu0 %v312_v28  ;;  %842 = vmatprep.mubr.f32.mxu1 %v316_v29 }
  0x81   : > { %837 = vmatmul.mubr.f32.gmra.mrb[2].mxu0 %v313_v30  ;;  %843 = vmatmul.mubr.f32.gmra.mrb[2].mxu1 %v317_v31 }
 0x150   : > { %v835_v33 = vpop.f32.mrb[0].mxu0  ;;  %v841_v34 = vpop.f32.mrb[0].mxu1 }
 0x151   : > { %490 = vst [vmem:[%s286_s25 + $0x8] sm:$0xff] %v835_v33  ;;  %v512_v35 = vmul.f32 %v835_v33, %v835_v33  ;;  %v400_v36 = vpop.f32.mrb[1].mxu0  ;;  %494 = vst [vmem:[%s286_s25 + $0x28] sm:$0xff] %v841_v34  ;;  %v420_v37 = vpop.f32.mrb[1].mxu1 }
 0x152   : > { %489 = vst [vmem:[%s286_s25] sm:$0xff] %v400_v36  ;;  %v497_v38 = vadd.f32 %v835_v33, %v400_v36  ;;  %v511_v39 = vmul.f32 %v400_v36, %v400_v36  ;;  %493 = vst [vmem:[%s286_s25 + $0x20] sm:$0xff] %v420_v37 }
 0x154   : > { %v519_v40 = vadd.f32 %v512_v35, %v511_v39  ;;  %v838_v41 = vpop.f32.mrb[2].mxu0  ;;  %v844_v42 = vpop.f32.mrb[2].mxu1 }
 0x155   : > { %492 = vst [vmem:[%s286_s25 + $0x18] sm:$0xff] %v838_v41  ;;  %v410_v43 = vpop.f32.mrb[3].mxu0  ;;  %496 = vst [vmem:[%s286_s25 + $0x38] sm:$0xff] %v844_v42  ;;  %v430_v44 = vpop.f32.mrb[3].mxu1 }
 0x156   : > { %491 = vst [vmem:[%s286_s25 + $0x10] sm:$0xff] %v410_v43  ;;  %v498_v45 = vadd.f32 %v497_v38, %v410_v43  ;;  %v513_v46 = vmul.f32 %v410_v43, %v410_v43  ;;  %495 = vst [vmem:[%s286_s25 + $0x30] sm:$0xff] %v430_v44 }
 0x157   : > { %1052 = shalt.err (!%p1049_p9)
}
 0x158   : > { %s1053_s6 = scalar_lea.hbm %s1418_s27, 1024  ;;  %s1057_s14 = scalar_lea.hbm %s1539_s2, 2048 }
 0x159   : > { %p1054_p1 = scmp.ne.s32.totalorder %s1418_s27, %s1053_s6  ;;  %p1058_p7 = scmp.lt.u32.totalorder %s1418_s27, %s1539_s2 }
 0x15a   : > { %p1059_p13 = scmp.lt.u32.totalorder %s1057_s14, %s1053_s6  ;;  %p1061_p6 = scmp.lt.u32.totalorder %s1053_s6, %s1418_s27 }
 0x15b   : > { %p1055_p2 = pnand %p1054_p1, %p1319_p10 }
 0x15c   : > { %p1060_p4 = por %p1059_p13, %p1058_p7 }
 0x15d   : > { %p1056_p3 = pneg %p1055_p2 }
 0x15e   : > { %p1062_p8 = por %p1061_p6, %p1060_p4 }
 0x160   : > { %p1063_p12 = pnand %p1062_p8, %p1056_p3 }
 0x162   : > { %1066 = shalt.err (!%p1063_p12)
}
 0x163   : > { %s1193_s9 = smov 128   ;;  %s1194_s5 = smov 8   ;;  %v514_v47 = vmul.f32 %v838_v41, %v838_v41  ;;  %v499_v48 = vadd.f32 %v838_v41, %v498_v45  ;;  %v520_v49 = vadd.f32 %v519_v40, %v513_v46  ;;  %v515_v50 = vmul.f32 %v420_v37, %v420_v37  ;;  %v533_v8 = vld [vmem:[%s1403_s22] sm:$0x1] }
 0x164   : > { %899 = dma.vmem_to_hbm [thread:$0]  (%p1319_p10), %s1413_s12, 1024, %s1418_s27, %s540_s7, %s1193_s9, %s1193_s9, %s1194_s5   ;;  %v516_v53 = vmul.f32 %v841_v34, %v841_v34  ;;  %v517_v56 = vmul.f32 %v430_v44, %v430_v44  ;;  %v518_v59 = vmul.f32 %v844_v42, %v844_v42 }
 0x165   : > { %v521_v51 = vadd.f32 %v520_v49, %v514_v47  ;;  %v500_v52 = vadd.f32 %v499_v48, %v420_v37  ;;  %s544_s10 = sand.u32 1, %s1253_s21   ;;  %s771_s12 = sshll.u32 %s1177_s18, 4  ;;  %v536_v11 = vld [vmem:[%s1407_s23] sm:$0x1] }
 0x166   : > { %s581_s27 = sshll.u32 %s1403_s22, 4  ;;  %s595_s7 = sshll.u32 %s1407_s23, 4  ;;  %s1455_s27 = int_to_ptr.vmem [resolvable:$true] %s581_s27  ;;  %s1463_s7 = int_to_ptr.vmem [resolvable:$true] %s595_s7 }
 0x167   : > { %v522_v54 = vadd.f32 %v521_v51, %v515_v50  ;;  %v501_v55 = vadd.f32 %v841_v34, %v500_v52  ;;  %s1453_s25 = scalar_lea.hbm %s1540_s3, %s771_s12  ;;  %s1461_s13 = scalar_lea.hbm %s1541_s4, %s771_s12 }
 0x168   : > { %s1465_s14 = scalar_lea.sflag [#allocation10], %s544_s10  ;;  %s1067_s30 = scalar_lea.vmem %s1455_s27, 16 }
 0x169   : > { %v502_v57 = vadd.f32 %v501_v55, %v430_v44  ;;  %v523_v58 = vadd.f32 %v522_v54, %v516_v53  ;;  %p1068_p11 = scmp.ne.s32.totalorder %s1455_s27, %s1067_s30  ;;  %s1195_s11 = smov [#allocation9]  }
 0x16a   : > { %s1071_s9 = sshll.u32 %s1195_s11, 4  ;;  %s1072_s9 = int_to_ptr.vmem [resolvable:$false] %s1071_s9 }
 0x16b   : > { %v503_v60 = vadd.f32 %v844_v42, %v502_v57  ;;  %v524_v61 = vadd.f32 %v523_v58, %v517_v56  ;;  %p1069_p0 = pnand %p1068_p11, %p1319_p10  ;;  %s1073_s5 = scalar_lea.vmem %s1072_s9, 32 }
 0x16c   : > { %p1074_p9 = scmp.lt.s32.totalorder %s1455_s27, %s1072_s9  ;;  %p1075_p1 = scmp.lt.s32.totalorder %s1073_s5, %s1067_s30 }
 0x16d   : > { %v504_v62 = vrot.slane %v503_v60, 4  ;;  %v525_v63 = vadd.f32 %v524_v61, %v518_v59  ;;  %p1070_p5 = pneg %p1069_p0 }
 0x16e   : > { %p1076_p2 = por %p1075_p1, %p1074_p9 }
 0x16f   : > { %v505_v0 = vadd.f32 %v504_v62, %v503_v60  ;;  %v526_v1 = vrot.slane %v525_v63, 4 }
 0x170   : > { %p1077_p3 = pnand %p1076_p2, %p1070_p5 }
 0x171   : > { %v506_v2 = vrot.slane %v505_v0, 2  ;;  %v527_v3 = vadd.f32 %v526_v1, %v525_v63 }
 0x173   : > { %v507_v4 = vadd.f32 %v506_v2, %v505_v0  ;;  %v528_v5 = vrot.slane %v527_v3, 2 }
 0x175   : > { %v508_v6 = vrot.slane %v507_v4, 1  ;;  %v529_v7 = vadd.f32 %v528_v5, %v527_v3 }
 0x177   : > { %v509_v9 = vadd.f32 %v508_v6, %v507_v4  ;;  %v530_v10 = vrot.slane %v529_v7, 1 }
 0x179   : > { %v531_v12 = vadd.f32 %v530_v10, %v529_v7  ;;  %v534_v13 = vadd.f32 %v533_v8, %v509_v9 }
 0x17b   : > { %535 = vst [vmem:[%s1403_s22] sm:$0x1] %v534_v13  ;;  %v537_v14 = vadd.f32 %v536_v11, %v531_v12 }
 0x17c   : > { %1080 = shalt.err (!%p1077_p3)
}
 0x17d   : > { %s1081_s22 = scalar_lea.hbm %s1453_s25, 16  ;;  %s1085_s26 = scalar_lea.hbm %s1540_s3, 32 }
 0x17e   : > { %p1082_p7 = scmp.ne.s32.totalorder %s1453_s25, %s1081_s22  ;;  %p1086_p6 = scmp.lt.u32.totalorder %s1453_s25, %s1540_s3 }
 0x17f   : > { %p1087_p8 = scmp.lt.u32.totalorder %s1085_s26, %s1081_s22  ;;  %p1089_p11 = scmp.lt.u32.totalorder %s1081_s22, %s1453_s25 }
 0x180   : > { %p1083_p13 = pnand %p1082_p7, %p1319_p10 }
 0x181   : > { %p1088_p12 = por %p1087_p8, %p1086_p6 }
 0x182   : > { %p1084_p4 = pneg %p1083_p13 }
 0x183   : > { %p1090_p0 = por %p1089_p11, %p1088_p12 }
 0x185   : > { %p1091_p5 = pnand %p1090_p0, %p1084_p4 }
 0x187   : > { %1094 = shalt.err (!%p1091_p5)
}
 0x188   : > { %900 = dma.vmem_to_hbm [thread:$0]  (%p1319_p10), %s1455_s27, 16, %s1453_s25, %s1465_s14   ;;  %538 = vst [vmem:[%s1407_s23] sm:$0x1] %v537_v14 }
 0x189   : > { %s1095_s21 = scalar_lea.vmem %s1463_s7, 16  ;;  %s1196_s30 = smov [#allocation11]  }
 0x18a   : > { %p1096_p9 = scmp.ne.s32.totalorder %s1463_s7, %s1095_s21  ;;  %s1099_s11 = sshll.u32 %s1196_s30, 4  ;;  %s1100_s11 = int_to_ptr.vmem [resolvable:$false] %s1099_s11 }
 0x18b   : > { %s1101_s9 = scalar_lea.vmem %s1100_s11, 32  ;;  %p1102_p3 = scmp.lt.s32.totalorder %s1463_s7, %s1100_s11 }
 0x18c   : > { %p1097_p1 = pnand %p1096_p9, %p1319_p10  ;;  %p1103_p7 = scmp.lt.s32.totalorder %s1101_s9, %s1095_s21 }
 0x18e   : > { %p1098_p2 = pneg %p1097_p1  ;;  %p1104_p13 = por %p1103_p7, %p1102_p3 }
 0x190   : > { %p1105_p4 = pnand %p1104_p13, %p1098_p2 }
 0x192   : > { %1108 = shalt.err (!%p1105_p4)
}
 0x193   : > { %s1109_s23 = scalar_lea.hbm %s1461_s13, 16  ;;  %s1113_s5 = scalar_lea.hbm %s1541_s4, 32 }
 0x194   : > { %p1110_p6 = scmp.ne.s32.totalorder %s1461_s13, %s1109_s23  ;;  %p1114_p11 = scmp.lt.u32.totalorder %s1461_s13, %s1541_s4 }
 0x195   : > { %p1115_p0 = scmp.lt.u32.totalorder %s1113_s5, %s1109_s23  ;;  %p1117_p9 = scmp.lt.u32.totalorder %s1109_s23, %s1461_s13 }
 0x196   : > { %p1111_p8 = pnand %p1110_p6, %p1319_p10 }
 0x197   : > { %p1116_p5 = por %p1115_p0, %p1114_p11 }
 0x198   : > { %p1112_p12 = pneg %p1111_p8 }
 0x199   : > { %p1118_p1 = por %p1117_p9, %p1116_p5 }
 0x19b   : > { %p1119_p2 = pnand %p1118_p1, %p1112_p12 }
 0x19d   : > { %1122 = shalt.err (!%p1119_p2)
}
 0x19e   : > { %901 = dma.vmem_to_hbm [thread:$0]  (%p1319_p10), %s1463_s7, 16, %s1461_s13, %s1465_s14  }
 0x19f PF: > { %s607_s12 = sand.u32 1, %s1165_s15   ;;  %p1558_p3 = scmp.ne.s32.totalorder %s1547_s24, 0 }
 0x1a0   : > { %p1559_p7 = scmp.ge.s32.totalorder %s1185_s20, 2  ;;  %s608_s26 = scalar_lea.sflag [#allocation5], %s607_s12 }
 0x1a2   : > { %p914_p13 = pnand %p1559_p7, %p1558_p3 }
 0x1a4   : > { %1156 = dma.done.wait (!%p914_p13), %s608_s26, 1024  }
 0x1a5   : > { %1158 = vsyncadd (!%p914_p13), %s608_s26, 4294966272  ;;  %s1560_s6 = sadd.s32 4294967294, %s1185_s20  }
 0x1a6   : > { %s616_s18 = sand.u32 1, %s1560_s6  }
 0x1a7   : > { %s617_s21 = scalar_lea.sflag [#allocation10], %s616_s18 }
 0x1a8   : > { %1160 = dma.done.wait (!%p914_p13), %s617_s21, 32  }
 0x1a9   : > { %1162 = vsyncadd (!%p914_p13), %s617_s21, 4294967264  ;;  %s25_s20 = sadd.s32 1, %s1185_s20   ;;  %s1561_s15 = smov %s1169_s16 }
 0x1aa   : > { %p22_p10 = scmp.ge.s32.totalorder %s25_s20, 4   ;;  %s1562_s16 = smov %s1173_s17 }
 0x1ab   : > { %s1563_s17 = smov %s1328_s8  ;;  %s1564_s18 = smov %s1181_s19 }
 0x1ac   : > { %s1565_s19 = smov %s1567_s29  ;;  %24 = sbr.rel (!%p22_p10) target bundleno = 9 (0x9), region = 126 }
 0x1b3   :  { %629 = vsyncpa [#allocation4], 1 }
 0x1b4   :  { %631 = vsyncpa [#allocation4 + $0x1], 1 }
 0x1b5   :  { %632 = vsyncpa [#allocation7], 1 }
 0x1b6   :  { %633 = vsyncpa [#allocation5], 1 }
 0x1b7   :  { %635 = vsyncpa [#allocation5 + $0x1], 1 }
 0x1b8   :  { %636 = vsyncpa [#allocation10], 1 }
 0x1b9   :  { %638 = vsyncpa [#allocation10 + $0x1], 1 }

</bundles_post_ra>
